<compile_context>
chip_gen: v7x
topology: tpu7x:2x2x1
jax: 0.10.0
libtpu: 0.0.40
codegen_flags: <defaults>
</compile_context>

<pallas_src>
import jax
import jax.numpy as jnp
from jax import lax
from jax.experimental import pallas as pl
from jax.experimental.pallas import tpu as pltpu

LANE = 128
MXU_N = 256  # full-width MXU pass on v6e/v7x (also valid, just padded, on v5e)


def _round_up(x, m):
    return (x + m - 1) // m * m


def _temporal_block_kernel(x_ref, res_ref, w1_ref, w2_ref,
                           s1_ref, b1_ref, s2_ref, b2_ref, o_ref):
    """One grid step = one lane-packed slab of batch elements.

    x_ref  : (1, K*Cp, CW)  im2col RHS (prebuilt in wrapper), matmul dtype
    res_ref: (1, Cp, CW)    residual slab, matmul dtype
    w1_ref : (Cp, K*Cp)     conv1 weights, tap-major columns, matmul dtype
    w2_ref : (Cp, Cp)       conv2 (1x1) weights, matmul dtype
    s1/b1  : (Cp, 1)        BN1 scale / shift, f32 (eval-mode running stats)
    s2/b2  : (Cp, 1)        BN2 scale / shift, f32
    o_ref  : (1, Cp, CW)    output slab
    """
    rhs = x_ref[0]                                            # (K*Cp, CW)

    # conv1 (all taps fused into one MXU matmul) + bn1 + relu
    # (dropout = identity in eval mode)
    h = jnp.dot(w1_ref[...], rhs, preferred_element_type=jnp.float32)
    h = jnp.maximum(h * s1_ref[...] + b1_ref[...], 0.0)

    # conv2 (1x1) + bn2 + relu
    h = jnp.dot(w2_ref[...], h.astype(w2_ref.dtype),
                preferred_element_type=jnp.float32)
    h = jnp.maximum(h * s2_ref[...] + b2_ref[...], 0.0)

    # residual add; full-width, lane-dense store
    o_ref[0] = (h + res_ref[0].astype(jnp.float32)).astype(o_ref.dtype)


def temporal_block_forward(x, conv1_w, conv2_w, bn1, bn2, *, kernel_size, stride,
                           dilation, padding, pad, one_frame,
                           matmul_dtype=jnp.bfloat16, lane_target=512):
    """x: (N, C, L) f32.  conv1_w: (C, C, K).  conv2_w: (C, C, 1).
    bn1/bn2: (gamma, beta, running_mean, running_var, eps) tuples (eval mode)."""
    # TODO(synk): zero-padded convs (padding > 0) are not implemented in-kernel.
    assert padding == 0, "only padding=0 supported"
    # TODO(synk): training-mode dropout / batch-stat BN not reproduced (eval only).
    N, C, L = x.shape
    K = kernel_size
    L1 = (L - dilation * (K - 1) - 1) // stride + 1          # conv1 output length

    msz = jnp.dtype(matmul_dtype).itemsize
    sub = 16 if msz == 2 else 8                              # sublane multiple
    Cp = _round_up(C, sub)

    # ---- residual, sliced in the XLA wrapper (no strided slices in-kernel) ----
    if one_frame:
        res = x[:, :, K // 2::K]
    else:
        res = x[:, :, pad:L - pad]
    assert res.shape[2] == L1, (res.shape, L1)

    # ---- batch packing: Nb batch elements per grid step along the lane axis ---
    Nb = max(1, min(N, lane_target // max(L1, 1)))
    if N > 1:
        # v7x megacore: keep several grid steps so "parallel" axis can shard
        # across the 2 TensorCores and still leave steps for prefetch/writeback.
        min_steps = min(N, 4)
        Nb = min(Nb, max(1, N // min_steps))
    Ng = pl.cdiv(N, Nb)
    Npad = Ng * Nb
    align = MXU_N if Nb * L1 > LANE else LANE
    CW = _round_up(Nb * L1, align)        # lane-dense per-step output width

    def pack(a, width, dtype):
        # (Npad, R, width) -> (Ng, R, CW); batch elements laid along lanes.
        R = a.shape[1]
        a = (a.reshape(Ng, Nb, R, width).transpose(0, 2, 1, 3)
              .reshape(Ng, R, Nb * width))
        a = jnp.pad(a, ((0, 0), (0, 0), (0, CW - Nb * width)))
        return a.astype(dtype)

    # ---- im2col RHS prebuilt in the wrapper for ALL strides -------------------
    xp = jnp.pad(x, ((0, Npad - N), (0, Cp - C), (0, 0)))    # (Npad, Cp, L)
    taps = [xp[:, :, k * dilation: k * dilation + (L1 - 1) * stride + 1: stride]
            for k in range(K)]                               # each (Npad, Cp, L1)
    xim = jnp.concatenate(taps, axis=1)                      # (Npad, K*Cp, L1)
    x3 = pack(xim, L1, matmul_dtype)                         # (Ng, K*Cp, CW)

    resp = jnp.pad(res, ((0, Npad - N), (0, Cp - C), (0, 0)))
    res3 = pack(resp, L1, matmul_dtype)                      # (Ng, Cp, CW)

    # ---- BN (eval-mode running stats) as per-channel scale/shift, kept f32 ----
    def bn_params(bn):
        gamma, beta, mean, var, eps = bn
        scale = gamma / jnp.sqrt(var + eps)
        shift = beta - mean * scale
        scale = jnp.pad(scale.astype(jnp.float32), (0, Cp - C)).reshape(Cp, 1)
        shift = jnp.pad(shift.astype(jnp.float32), (0, Cp - C)).reshape(Cp, 1)
        return scale, shift

    s1, b1 = bn_params(bn1)
    s2, b2 = bn_params(bn2)

    # conv weights, channel-padded, tap-major columns, matmul dtype (scale NOT
    # folded in -> full bf16 weight precision).
    w1p = jnp.pad(conv1_w, ((0, Cp - C), (0, Cp - C), (0, 0)))
    w1p = jnp.transpose(w1p, (0, 2, 1)).reshape(Cp, K * Cp).astype(matmul_dtype)
    w2p = jnp.pad(conv2_w[:, :, 0], ((0, Cp - C), (0, Cp - C))).astype(matmul_dtype)

    # ---- advisory cost estimate & VMEM budget ---------------------------------
    osz = jnp.dtype(x.dtype).itemsize
    flops = 2 * Ng * CW * (Cp * K * Cp + Cp * Cp)
    bytes_accessed = int(x3.size * msz + res3.size * msz + Ng * Cp * CW * osz
                         + (w1p.size + w2p.size) * msz + 4 * Cp * 4)
    cost = pl.CostEstimate(flops=int(flops), transcendentals=0,
                           bytes_accessed=bytes_accessed)

    per_step = (2 * (K * Cp * CW * msz)          # double-buffered im2col input
                + 2 * (Cp * CW * msz)            # double-buffered residual
                + 2 * (Cp * CW * osz)            # double-buffered output
                + (Cp * K * Cp + Cp * Cp) * msz  # weights
                + 4 * Cp * 4                     # BN scale/shift
                + 3 * Cp * CW * 4)               # f32 intermediates headroom
    # Raise the scoped-VMEM limit only if we actually need it (v5e default is
    # 16 MiB); cap well below v7x's 64 MiB physical VMEM.
    vmem_limit = None if per_step < (12 << 20) else int(min(2 * per_step, 48 << 20))

    out3 = pl.pallas_call(
        _temporal_block_kernel,
        out_shape=jax.ShapeDtypeStruct((Ng, Cp, CW), x.dtype),
        grid=(Ng,),
        in_specs=[
            pl.BlockSpec((1, K * Cp, CW), lambda n: (n, 0, 0)),   # im2col x
            pl.BlockSpec((1, Cp, CW), lambda n: (n, 0, 0)),       # residual
            pl.BlockSpec((Cp, K * Cp), lambda n: (0, 0)),         # w1
            pl.BlockSpec((Cp, Cp), lambda n: (0, 0)),             # w2
            pl.BlockSpec((Cp, 1), lambda n: (0, 0)),              # bn1 scale
            pl.BlockSpec((Cp, 1), lambda n: (0, 0)),              # bn1 shift
            pl.BlockSpec((Cp, 1), lambda n: (0, 0)),              # bn2 scale
            pl.BlockSpec((Cp, 1), lambda n: (0, 0)),              # bn2 shift
        ],
        out_specs=pl.BlockSpec((1, Cp, CW), lambda n: (n, 0, 0)),
        compiler_params=pltpu.CompilerParams(
            dimension_semantics=("parallel",),
            vmem_limit_bytes=vmem_limit),
        cost_estimate=cost,
    )(x3, res3, w1p, w2p, s1, b1, s2, b2)

    # TODO(synk): the unpack below is one extra XLA pass over the output; for
    # layouts where L1 >= lane_target (Nb == 1) it degenerates to a cheap slice.
    out = out3[:, :C, :Nb * L1].reshape(Ng, C, Nb, L1)
    out = out.transpose(0, 2, 1, 3).reshape(Npad, C, L1)[:N]
    return out


def reference_forward(x, conv1_w, conv2_w, bn1, bn2, *, kernel_size, stride,
                      dilation, padding, pad, one_frame):
    """Pure-JAX reference (lax conv) mirroring the PyTorch eval-mode forward."""
    def bn_apply(y, bn):
        gamma, beta, mean, var, eps = bn
        scale = gamma / jnp.sqrt(var + eps)
        shift = beta - mean * scale
        return y * scale[None, :, None] + shift[None, :, None]

    dn = ("NCH", "OIH", "NCH")
    y = lax.conv_general_dilated(x, conv1_w, window_strides=(stride,),
                                 padding=[(padding, padding)],
                                 rhs_dilation=(dilation,), dimension_numbers=dn)
    y = jax.nn.relu(bn_apply(y, bn1))
    y = lax.conv_general_dilated(y, conv2_w, window_strides=(1,),
                                 padding=[(padding, padding)],
                                 rhs_dilation=(1,), dimension_numbers=dn)
    y = jax.nn.relu(bn_apply(y, bn2))
    if one_frame:
        res = x[..., kernel_size // 2::kernel_size]
    else:
        res = x[..., pad:x.shape[2] - pad]
    return y + res


if __name__ == "__main__":
    def make_inputs(key, N, C, L, K):
        kx, kw1, kw2 = jax.random.split(key, 3)
        x = jax.random.normal(kx, (N, C, L), dtype=jnp.float32)
        conv1_w = 0.01 * jax.random.normal(kw1, (C, C, K), dtype=jnp.float32)
        conv2_w = 0.01 * jax.random.normal(kw2, (C, C, 1), dtype=jnp.float32)
        bn = (jnp.ones((C,), jnp.float32), jnp.zeros((C,), jnp.float32),
              jnp.zeros((C,), jnp.float32), jnp.ones((C,), jnp.float32), 1e-5)
        return x, conv1_w, conv2_w, bn

    N, C, L, K = 2, 8, 16, 3

    # --- config 1: standard TCN block (stride=1, pad-residual) ---
    cfg1 = dict(kernel_size=K, stride=1, dilation=1, padding=0, pad=1,
                one_frame=False)
    x, w1, w2, bn = make_inputs(jax.random.PRNGKey(0), N, C, L, K)
    ref1 = reference_forward(x, w1, w2, bn, bn, **cfg1)

    out_f32 = temporal_block_forward(x, w1, w2, bn, bn,
                                     matmul_dtype=jnp.float32, **cfg1)
    out_f32 = jax.block_until_ready(out_f32)
    assert out_f32.shape == ref1.shape, (out_f32.shape, ref1.shape)
    assert jnp.allclose(out_f32, ref1, atol=1e-4, rtol=1e-4), \
        float(jnp.max(jnp.abs(out_f32 - ref1)))

    out_bf16 = temporal_block_forward(x, w1, w2, bn, bn, **cfg1)   # bf16 matmuls
    out_bf16 = jax.block_until_ready(out_bf16)
    assert jnp.allclose(out_bf16, ref1, atol=5e-3, rtol=5e-3), \
        float(jnp.max(jnp.abs(out_bf16 - ref1)))

    # --- config 2: one_frame block (stride == kernel_size) ---
    # exercises the strided-tap im2col path and the strided residual.
    cfg2 = dict(kernel_size=K, stride=K, dilation=1, padding=0, pad=0,
                one_frame=True)
    x2, w1b, w2b, bnb = make_inputs(jax.random.PRNGKey(1), N, C, L, K)
    ref2 = reference_forward(x2, w1b, w2b, bnb, bnb, **cfg2)
    out2 = temporal_block_forward(x2, w1b, w2b, bnb, bnb, **cfg2)
    out2 = jax.block_until_ready(out2)
    assert out2.shape == ref2.shape, (out2.shape, ref2.shape)
    assert jnp.allclose(out2, ref2, atol=5e-3, rtol=5e-3), \
        float(jnp.max(jnp.abs(out2 - ref2)))

    print("KERNEL_OK")
</pallas_src>

<mosaic_0001>
module attributes {stable_mosaic.version = 11 : i64} {
  func.func @_temporal_block_kernel(%arg0: i32, %arg1: memref<1x24x128xf32, #tpu.memory_space<vmem>>, %arg2: memref<1x8x128xf32, #tpu.memory_space<vmem>>, %arg3: memref<8x24xf32, #tpu.memory_space<vmem>>, %arg4: memref<8x8xf32, #tpu.memory_space<vmem>>, %arg5: memref<8x1xf32, #tpu.memory_space<vmem>>, %arg6: memref<8x1xf32, #tpu.memory_space<vmem>>, %arg7: memref<8x1xf32, #tpu.memory_space<vmem>>, %arg8: memref<8x1xf32, #tpu.memory_space<vmem>>, %arg9: memref<1x8x128xf32, #tpu.memory_space<vmem>>) attributes {dimension_semantics = [#tpu.dimension_semantics<parallel>], iteration_bounds = array<i64: 2>, scalar_prefetch = 0 : i64, scratch_operands = 0 : i64, tpu.core_type = #tpu.core_type<tc>, window_params = [{transform_indices = @transform_0, window_bounds = array<i64: 1, 24, 128>}, {transform_indices = @transform_1, window_bounds = array<i64: 1, 8, 128>}, {pipeline_mode = #tpu.pipeline_mode<synchronous>, transform_indices = @transform_2, window_bounds = array<i64: 8, 24>}, {pipeline_mode = #tpu.pipeline_mode<synchronous>, transform_indices = @transform_3, window_bounds = array<i64: 8, 8>}, {pipeline_mode = #tpu.pipeline_mode<synchronous>, transform_indices = @transform_4, window_bounds = array<i64: 8, 1>}, {pipeline_mode = #tpu.pipeline_mode<synchronous>, transform_indices = @transform_5, window_bounds = array<i64: 8, 1>}, {pipeline_mode = #tpu.pipeline_mode<synchronous>, transform_indices = @transform_6, window_bounds = array<i64: 8, 1>}, {pipeline_mode = #tpu.pipeline_mode<synchronous>, transform_indices = @transform_7, window_bounds = array<i64: 8, 1>}, {transform_indices = @transform_8, window_bounds = array<i64: 1, 8, 128>}]} {
    %c0 = arith.constant 0 : index
    %c0_0 = arith.constant 0 : index
    %c0_1 = arith.constant 0 : index
    %0 = vector.load %arg1[%c0, %c0_0, %c0_1] : memref<1x24x128xf32, #tpu.memory_space<vmem>>, vector<1x24x128xf32>
    %1 = vector.shape_cast %0 : vector<1x24x128xf32> to vector<24x128xf32>
    %c0_2 = arith.constant 0 : index
    %c0_3 = arith.constant 0 : index
    %2 = vector.load %arg3[%c0_2, %c0_3] : memref<8x24xf32, #tpu.memory_space<vmem>>, vector<8x24xf32>
    %cst = arith.constant dense<0.000000e+00> : vector<8x128xf32>
    %3 = tpu.matmul %2, %1, %cst {dimension_numbers = #tpu.dot_dimension_numbers<[1], [0], [0], [1], [0, 0, 1, 1], [], []>} : vector<8x24xf32>, vector<24x128xf32>, vector<8x128xf32> -> vector<8x128xf32>
    %c0_4 = arith.constant 0 : index
    %c0_5 = arith.constant 0 : index
    %4 = vector.load %arg5[%c0_4, %c0_5] : memref<8x1xf32, #tpu.memory_space<vmem>>, vector<8x1xf32>
    %5 = vector.broadcast %4 : vector<8x1xf32> to vector<8x128xf32>
    %6 = arith.mulf %3, %5 : vector<8x128xf32>
    %c0_6 = arith.constant 0 : index
    %c0_7 = arith.constant 0 : index
    %7 = vector.load %arg6[%c0_6, %c0_7] : memref<8x1xf32, #tpu.memory_space<vmem>>, vector<8x1xf32>
    %8 = vector.broadcast %7 : vector<8x1xf32> to vector<8x128xf32>
    %9 = arith.addf %6, %8 : vector<8x128xf32>
    %cst_8 = arith.constant 0.000000e+00 : f32
    %10 = vector.broadcast %cst_8 : f32 to vector<8x128xf32>
    %11 = arith.maximumf %9, %10 : vector<8x128xf32>
    %c0_9 = arith.constant 0 : index
    %c0_10 = arith.constant 0 : index
    %12 = vector.load %arg4[%c0_9, %c0_10] : memref<8x8xf32, #tpu.memory_space<vmem>>, vector<8x8xf32>
    %cst_11 = arith.constant dense<0.000000e+00> : vector<8x128xf32>
    %13 = tpu.matmul %12, %11, %cst_11 {dimension_numbers = #tpu.dot_dimension_numbers<[1], [0], [0], [1], [0, 0, 1, 1], [], []>} : vector<8x8xf32>, vector<8x128xf32>, vector<8x128xf32> -> vector<8x128xf32>
    %c0_12 = arith.constant 0 : index
    %c0_13 = arith.constant 0 : index
    %14 = vector.load %arg7[%c0_12, %c0_13] : memref<8x1xf32, #tpu.memory_space<vmem>>, vector<8x1xf32>
    %15 = vector.broadcast %14 : vector<8x1xf32> to vector<8x128xf32>
    %16 = arith.mulf %13, %15 : vector<8x128xf32>
    %c0_14 = arith.constant 0 : index
    %c0_15 = arith.constant 0 : index
    %17 = vector.load %arg8[%c0_14, %c0_15] : memref<8x1xf32, #tpu.memory_space<vmem>>, vector<8x1xf32>
    %18 = vector.broadcast %17 : vector<8x1xf32> to vector<8x128xf32>
    %19 = arith.addf %16, %18 : vector<8x128xf32>
    %cst_16 = arith.constant 0.000000e+00 : f32
    %20 = vector.broadcast %cst_16 : f32 to vector<8x128xf32>
    %21 = arith.maximumf %19, %20 : vector<8x128xf32>
    %c0_17 = arith.constant 0 : index
    %c0_18 = arith.constant 0 : index
    %c0_19 = arith.constant 0 : index
    %22 = vector.load %arg2[%c0_17, %c0_18, %c0_19] : memref<1x8x128xf32, #tpu.memory_space<vmem>>, vector<1x8x128xf32>
    %23 = vector.shape_cast %22 : vector<1x8x128xf32> to vector<8x128xf32>
    %24 = arith.addf %21, %23 : vector<8x128xf32>
    %c0_20 = arith.constant 0 : index
    %c0_21 = arith.constant 0 : index
    %c0_22 = arith.constant 0 : index
    %25 = vector.load %arg9[%c0_20, %c0_21, %c0_22] : memref<1x8x128xf32, #tpu.memory_space<vmem>>, vector<1x8x128xf32>
    %26 = vector.shape_cast %25 : vector<1x8x128xf32> to vector<8x128xf32>
    %27 = vector.shape_cast %24 : vector<8x128xf32> to vector<1x8x128xf32>
    tpu.vector_store %arg9[%c0_20, %c0_21, %c0_22], %27 {strides = array<i32>} : memref<1x8x128xf32, #tpu.memory_space<vmem>>, vector<1x8x128xf32>,
    return
  }
  func.func @transform_0(%arg0: i32) -> (i32, i32, i32) {
    %c0_i32 = arith.constant 0 : i32
    %c0_i32_0 = arith.constant 0 : i32
    %c0_i32_1 = arith.constant 0 : i32
    return %arg0, %c0_i32, %c0_i32_0 : i32, i32, i32
  }
  func.func @transform_1(%arg0: i32) -> (i32, i32, i32) {
    %c0_i32 = arith.constant 0 : i32
    %c0_i32_0 = arith.constant 0 : i32
    %c0_i32_1 = arith.constant 0 : i32
    return %arg0, %c0_i32, %c0_i32_0 : i32, i32, i32
  }
  func.func @transform_2(%arg0: i32) -> (i32, i32) {
    %c0_i32 = arith.constant 0 : i32
    %c0_i32_0 = arith.constant 0 : i32
    %c0_i32_1 = arith.constant 0 : i32
    return %c0_i32, %c0_i32_0 : i32, i32
  }
  func.func @transform_3(%arg0: i32) -> (i32, i32) {
    %c0_i32 = arith.constant 0 : i32
    %c0_i32_0 = arith.constant 0 : i32
    %c0_i32_1 = arith.constant 0 : i32
    return %c0_i32, %c0_i32_0 : i32, i32
  }
  func.func @transform_4(%arg0: i32) -> (i32, i32) {
    %c0_i32 = arith.constant 0 : i32
    %c0_i32_0 = arith.constant 0 : i32
    %c0_i32_1 = arith.constant 0 : i32
    return %c0_i32, %c0_i32_0 : i32, i32
  }
  func.func @transform_5(%arg0: i32) -> (i32, i32) {
    %c0_i32 = arith.constant 0 : i32
    %c0_i32_0 = arith.constant 0 : i32
    %c0_i32_1 = arith.constant 0 : i32
    return %c0_i32, %c0_i32_0 : i32, i32
  }
  func.func @transform_6(%arg0: i32) -> (i32, i32) {
    %c0_i32 = arith.constant 0 : i32
    %c0_i32_0 = arith.constant 0 : i32
    %c0_i32_1 = arith.constant 0 : i32
    return %c0_i32, %c0_i32_0 : i32, i32
  }
  func.func @transform_7(%arg0: i32) -> (i32, i32) {
    %c0_i32 = arith.constant 0 : i32
    %c0_i32_0 = arith.constant 0 : i32
    %c0_i32_1 = arith.constant 0 : i32
    return %c0_i32, %c0_i32_0 : i32, i32
  }
  func.func @transform_8(%arg0: i32) -> (i32, i32, i32) {
    %c0_i32 = arith.constant 0 : i32
    %c0_i32_0 = arith.constant 0 : i32
    %c0_i32_1 = arith.constant 0 : i32
    return %arg0, %c0_i32, %c0_i32_0 : i32, i32, i32
  }
}

</mosaic_0001>

<bundles_post_ra>
// kernel: tpu_custom_call.1
= control target key start
LH: loop header
LB: loop body
LE: loop exit
PB: predicated region body
PF: predicated region fallthrough
CT: control target
= control target key end

     0   :  { %13 = vsyncpa [#allocation3], 0  ;;  %s1045_s0 = inlined_call_operand.hbm [shape: f32[2,24,128], index: 0, kind: input, shape index: {}]   ;;  %s1046_s1 = inlined_call_operand.vmem [shape: f32[2,8,128], index: 1, kind: input, shape index: {}]   ;;  %s1047_s2 = inlined_call_operand.vmem [shape: f32[8,24], index: 2, kind: input, shape index: {}]   ;;  %s1048_s3 = inlined_call_operand.vmem [shape: f32[8,8], index: 3, kind: input, shape index: {}]   ;;  %s1049_s4 = inlined_call_operand.vmem [shape: f32[8,1], index: 4, kind: input, shape index: {}]   ;;  %s1050_s5 = inlined_call_operand.vmem [shape: f32[8,1], index: 5, kind: input, shape index: {}]   ;;  %s1051_s6 = inlined_call_operand.vmem [shape: f32[8,1], index: 6, kind: input, shape index: {}]   ;;  %s1052_s7 = inlined_call_operand.vmem [shape: f32[8,1], index: 7, kind: input, shape index: {}]   ;;  %s1053_s8 = inlined_call_operand.hbm [shape: f32[2,8,128], index: 8, kind: output, shape index: {}]  }
   0x1   :  { %15 = vsyncpa [#allocation3 + $0x1], 0 }
   0x2   :  { %16 = vsyncpa [#allocation4], 0 }
   0x3   :  { %18 = vsyncpa [#allocation4 + $0x1], 0  ;;  %s867_s27 = smov 0   ;;  %s869_s28 = smov 0  }
   0x4   :  { %s871_s29 = smov 0   ;;  %s873_s30 = smov 0  }
   0x5 LB: > { %s888_s9 = sadd.s32 4294967295, %s812_s30   ;;  %s623_s10 = sadd.s32 4294967294, %s812_s30   ;;  %s812_s30 = sphi %s873_s30, %s1067_s30   ;;  %s808_s29 = sphi %s871_s29, %s1066_s29   ;;  %s804_s28 = sphi %s869_s28, %s1065_s28   ;;  %s800_s27 = sphi %s867_s27, %s1064_s27  }
   0x6   : > { %s892_s11 = sadd.s32 1, %s812_s30   ;;  %s31_s12 = sadd.s32 1, %s808_s29 }
   0x7   : > { %s28_s13 = ssub.s32 %s812_s30, %s892_s11  ;;  %p38_p0 = scmp.ne.s32.totalorder %s808_s29, %s804_s28 }
   0x8   : > { %p29_p1 = scmp.eq.s32.totalorder %s28_s13, 0  ;;  %p39_p2 = scmp.eq.s32.totalorder %s812_s30, 0 }
   0x9   : > { %p44_p3 = scmp.ne.s32.totalorder %s804_s28, %s800_s27  ;;  %p45_p4 = scmp.eq.s32.totalorder %s888_s9, 0 }
   0xa   : > { %s904_s14 = scalar_select %p29_p1, %s808_s29, %s31_s12  }
   0xb   : > { %p40_p5 = por %p39_p2, %p38_p0  ;;  %p906_p6 = por %p45_p4, %p44_p3 }
   0xc   : > { %1055 = sst [smem:[#allocation8_spill]] %s904_s14  ;;  %p220_p7 = scmp.eq.s32.totalorder %s888_s9, 1 }
   0xd   : > { %p226_p8 = scmp.eq.s32.totalorder %s623_s10, 1  ;;  %p674_p10 = scmp.lt.s32.totalorder %s812_s30, 2 }
   0xe   : > { %p913_p11 = por %p220_p7, %p38_p0  ;;  %s264_s18 = sand.u32 1, %s808_s29  }
   0xf   : > { %p917_p12 = por %p226_p8, %p44_p3  ;;  %s660_s19 = smul.u32 384, %s812_s30 }
  0x10   : > { %s1057_s16 = scalar_select %p913_p11, 1, 0 }
  0x11   : > { %s1058_s17 = scalar_select %p917_p12, 1, 0 }
  0x12   : > { %s659_s20 = smul.u32 24, %s264_s18  ;;  %s926_s23 = scalar_lea.hbm %s1045_s0, %s660_s19 }
  0x13   : > { %p928_p13 = pnand %p674_p10, %p40_p5  ;;  %s934_s10 = scalar_lea.sflag [#allocation3], %s264_s18 }
  0x14   : > { %s268_s25 = scalar_lea.vmem [#allocation2], %s659_s20  ;;  %s716_s12 = scalar_lea.hbm %s926_s23, 384 }
  0x15   : > { %s275_s26 = sshll.u32 %s268_s25, 4  ;;  %p717_p0 = scmp.ne.s32.totalorder %s926_s23, %s716_s12  ;;  %s932_s26 = int_to_ptr.vmem [resolvable:$true] %s275_s26 }
  0x16   : > { %p718_p1 = pneg %p928_p13  ;;  %s721_s21 = scalar_lea.hbm %s1045_s0, 768 }
  0x17   : > { %p722_p4 = scmp.lt.u32.totalorder %s926_s23, %s1045_s0  ;;  %p723_p5 = scmp.lt.u32.totalorder %s721_s21, %s716_s12 }
  0x18   : > { %p719_p2 = pnand %p718_p1, %p717_p0  ;;  %p725_p8 = scmp.lt.u32.totalorder %s716_s12, %s926_s23 }
  0x19   : > { %p724_p7 = por %p723_p5, %p722_p4 }
  0x1a   : > { %p720_p3 = pneg %p719_p2 }
  0x1b   : > { %p726_p10 = por %p725_p8, %p724_p7 }
  0x1d   : > { %p727_p9 = pnand %p726_p10, %p720_p3 }
  0x1f   : > { %730 = shalt.err (!%p727_p9)
}
  0x20   : > { %s731_s18 = scalar_lea.vmem %s932_s26, 384  ;;  %s814_s20 = smov [#allocation2]  }
  0x21   : > { %p732_p0 = scmp.ne.s32.totalorder %s932_s26, %s731_s18  ;;  %s736_s25 = sshll.u32 %s814_s20, 4  ;;  %s737_s25 = int_to_ptr.vmem [resolvable:$false] %s736_s25 }
  0x22   : > { %s738_s14 = scalar_lea.vmem %s737_s25, 768  ;;  %p739_p11 = scmp.lt.s32.totalorder %s932_s26, %s737_s25 }
  0x23   : > { %p734_p2 = pnand %p732_p0, %p718_p1  ;;  %p740_p4 = scmp.lt.s32.totalorder %s738_s14, %s731_s18 }
  0x25   : > { %p735_p12 = pneg %p734_p2  ;;  %p741_p5 = por %p740_p4, %p739_p11 }
  0x27   : > { %p742_p7 = pnand %p741_p5, %p735_p12 }
  0x29   : > { %745 = shalt.err (!%p742_p7)
}
  0x2a   : > { %s815_s12 = smov 128   ;;  %s816_s13 = smov 8  }
  0x2b   : > { %669 = dma.hbm_to_vmem [thread:$0]  (!%p928_p13), %s926_s23, 384, %s932_s26, %s934_s10, %s815_s12, %s815_s12, %s816_s13  }
  0x2c   : > { %p627_p9 = scmp.ge.s32.totalorder %s812_s30, 1  ;;  %p290_p1 = scmp.lt.s32.totalorder %s812_s30, 3 }
  0x2e   : > { %p291_p3 = pnand %p627_p9, %p290_p1 }
  0x2f   : > { %s965_s19 = sand.u32 (!%p291_p3), 1, %s804_s28  }
  0x30   : > { %294 = sbr.rel (%p291_p3) target bundleno = 518 (0x206), region = 52  ;;  %s297_s22 = scalar_lea.sflag (!%p291_p3), [#allocation3], %s965_s19 }
  0x31   : > { %s661_s21 = smul.u32 (!%p291_p3), 24, %s965_s19 }
  0x33   : > { %s300_s18 = scalar_lea.vmem (!%p291_p3), [#allocation2], %s661_s21 }
  0x37   : > { %791 = dma.done.wait (%p906_p6), %s297_s22, 384  }
  0x38   : > { %793 = vsyncadd (%p906_p6), %s297_s22, 4294966912  ;;  %v817_v0 = vmov 0.0|0.0   ;;  %vm818_vm0 = vmmov 0   ;;  %v819_v1 = vmov 0.0   ;;  %v820_v2 = vmov 0   ;;  %v341_v3 = vld [vmem:[%s300_s18] sm:$0xff] }
  0x39   : > { %656 = vmatprep.subr.bf16.mxu0 %v817_v0  ;;  %648 = vmatprep.mubr.msk.f32.mxu0 %vm818_vm0, %v819_v1  ;;  %v342_v4 = vld [vmem:[%s300_s18 + $0x8] sm:$0xff]  ;;  %v343_v8 = vld [vmem:[%s300_s18 + $0x10] sm:$0xff]  ;;  %vm345_vm1 = vcmask 195584   ;;  %vm435_vm2 = vcmask 64512   ;;  %p337_p6 = scmp.lt.s32.totalorder %s888_s9, 1  ;;  %s628_s24 = sshll.u32 %s965_s19, 3 }
  0x3a   : > { %714 = vset.pattern.permute.xlu0 %v820_v2  ;;  %651 = vmatprep.subr.mxu1 %v819_v1  ;;  %v657_v5 = vpack.c.bf16 %v342_v4, %v341_v3  ;;  %v419_v6 = vld [vmem:[%s1049_s4] sm:$0xff]  ;;  %s633_s20 = sshll.u32 %s888_s9, 7  ;;  %s336_s25 = scalar_lea.vmem [#allocation5], %s628_s24 }
  0x3b   : > { %653 = vmatprep.mubr.msk.f32.mxu1 %vm818_vm0, %v819_v1  ;;  %715 = vset.pattern.permute.xlu1 %v820_v2  ;;  %v426_v7 = vld [vmem:[%s1050_s5] sm:$0xff]  ;;  %s338_s18 = scalar_select %p337_p6, %s888_s9, 1 }
  0x3c   : > { %422 = vperm.xlu0 %714, %v419_v6   ;;  %658 = vmatpush3.bf16.msra.mxu0 %v657_v5  ;;  %v344_v9 = vld [vmem:[%s1047_s2] sm:$0xff]  ;;  %s541_s14 = sshll.u32 %s336_s25, 4  ;;  %s1001_s21 = scalar_lea.hbm %s1053_s8, %s633_s20  ;;  %s1003_s14 = int_to_ptr.vmem [resolvable:$true] %s541_s14 }
  0x3d   : > { %646 = vmatprep.subr.mxu0 %v819_v1  ;;  %v509_v10 = vld [vmem:[%s1051_s6] sm:$0xff]  ;;  %s629_s23 = sshll.u32 %s338_s18, 3  ;;  %s528_s22 = scalar_lea.sflag [#allocation4], %s965_s19 }
  0x3e   : > { %512 = vperm.xlu1 %715, %v509_v10   ;;  %v516_v11 = vld [vmem:[%s1052_s7] sm:$0xff]  ;;  %s340_s10 = scalar_lea.vmem %s1046_s1, %s629_s23  ;;  %s746_s18 = scalar_lea.vmem %s1003_s14, 128 }
  0x3f   : > { %v434_v19 = vld [vmem:[%s1048_s3] sm:$0xff]  ;;  %p747_p11 = scmp.ne.s32.totalorder %s1003_s14, %s746_s18  ;;  %p1060_p12 = scmp.ne.s32.totalorder %s1057_s16, 0 }
  0x40   : > { %429 = vperm.xlu0 %714, %v426_v7   ;;  %647 = vmatpush3.msra.mxu0 %v343_v8  ;;  %v524_v26 = vld [vmem:[%s340_s10] sm:$0xff]  ;;  %s821_s9 = smov [#allocation5]  }
  0x41   : > { %649 = vmatmul.mubr.msk.f32.vlgmr.msra.gmra.mrb[0].mxu0 %vm345_vm1, %v344_v9  ;;  %p748_p13 = pnand %p747_p11, %p1060_p12  ;;  %s750_s23 = sshll.u32 %s821_s9, 4  ;;  %s751_s23 = int_to_ptr.vmem [resolvable:$false] %s750_s23 }
  0x42   : > { %519 = vperm.xlu1 %715, %v516_v11   ;;  %s752_s24 = scalar_lea.vmem %s751_s23, 256  ;;  %p753_p10 = scmp.lt.s32.totalorder %s1003_s14, %s751_s23 }
  0x43   : > { %p749_p8 = pneg %p748_p13  ;;  %p754_p0 = scmp.lt.s32.totalorder %s752_s24, %s746_s18 }
  0x45   : > { %p755_p2 = por %p754_p0, %p753_p10 }
  0x47   : > { %p756_p4 = pnand %p755_p2, %p749_p8 }
  0xbb   : > { %v423_v12 = vpop.permute.xlu0 %422 }
  0xbd   : > { %v513_v20 = vpop.permute.xlu1 %512 }
  0xbf   : > { %v430_v16 = vpop.permute.xlu0 %429 }
  0xc1   : > { %v520_v24 = vpop.permute.xlu1 %519 }
 0x114   : > { %v415_v13 = vpop.f32.mrb[0].mxu0 }
 0x115   : > { %v425_v14 = vmul.f32 %v423_v12, %v415_v13  ;;  %v650_v15 = vpop.f32.mrb[1].mxu0 }
 0x117   : > { %v432_v17 = vadd.f32 %v430_v16, %v425_v14 }
 0x119   : > { %v433_v18 = vmax.f32 %v432_v17, 0.0 }
 0x11b   : > { %652 = vmatpush3.msra.mxu1 %v433_v18 }
 0x11c   : > { %654 = vmatmul.mubr.msk.f32.vlgmr.msra.gmra.mrb[0].mxu1 %vm435_vm2, %v434_v19 }
 0x1ef   : > { %v505_v21 = vpop.f32.mrb[0].mxu1 }
 0x1f0   : > { %v515_v22 = vmul.f32 %v513_v20, %v505_v21  ;;  %v655_v23 = vpop.f32.mrb[1].mxu1 }
 0x1f2   : > { %v522_v25 = vadd.f32 %v520_v24, %v515_v22 }
 0x1f4   : > { %v523_v27 = vmax.f32 %v522_v25, 0.0 }
 0x1f6   : > { %v525_v28 = vadd.f32 %v524_v26, %v523_v27 }
 0x1f8   : > { %526 = vst [vmem:[%s336_s25] sm:$0xff] %v525_v28 }
 0x1f9   : > { %759 = shalt.err (!%p756_p4)
}
 0x1fa   : > { %s760_s19 = scalar_lea.hbm %s1001_s21, 128  ;;  %s764_s10 = scalar_lea.hbm %s1053_s8, 256 }
 0x1fb   : > { %p761_p5 = scmp.ne.s32.totalorder %s1001_s21, %s760_s19  ;;  %p765_p1 = scmp.lt.u32.totalorder %s1001_s21, %s1053_s8 }
 0x1fc   : > { %p766_p3 = scmp.lt.u32.totalorder %s764_s10, %s760_s19  ;;  %p768_p11 = scmp.lt.u32.totalorder %s760_s19, %s1001_s21 }
 0x1fd   : > { %p762_p7 = pnand %p761_p5, %p1060_p12 }
 0x1fe   : > { %p767_p6 = por %p766_p3, %p765_p1 }
 0x1ff   : > { %p763_p9 = pneg %p762_p7 }
 0x200   : > { %p769_p13 = por %p768_p11, %p767_p6 }
 0x202   : > { %p770_p8 = pnand %p769_p13, %p763_p9 }
 0x204   : > { %773 = shalt.err (!%p770_p8)
}
 0x205   : > { %664 = dma.vmem_to_hbm [thread:$0]  (%p1060_p12), %s1003_s14, 128, %s1001_s21, %s528_s22  }
 0x206 PF: > { %s553_s12 = sand.u32 1, %s800_s27   ;;  %p1061_p10 = scmp.ne.s32.totalorder %s1058_s17, 0 }
 0x207   : > { %p1062_p0 = scmp.ge.s32.totalorder %s812_s30, 2  ;;  %s554_s13 = scalar_lea.sflag [#allocation4], %s553_s12 }
 0x209   : > { %p671_p2 = pnand %p1062_p0, %p1061_p10 }
 0x20b   : > { %795 = dma.done.wait (!%p671_p2), %s554_s13, 128  }
 0x20c   : > { %797 = vsyncadd (!%p671_p2), %s554_s13, 4294967168  ;;  %s1063_s18 = sld [smem:[#allocation8_spill]]  ;;  %p21_p4 = scmp.ge.s32.totalorder %s892_s11, 4  }
 0x20d   : > { %s1064_s27 = smov %s804_s28  ;;  %s1065_s28 = smov %s808_s29 }
 0x20e   : > { %s1067_s30 = smov %s892_s11  ;;  %23 = sbr.rel (!%p21_p4) target bundleno = 5 (0x5), region = 100 }
 0x212   : > { %s1066_s29 = smov %s1063_s18 }
 0x215   :  { %559 = vsyncpa [#allocation3], 1 }
 0x216   :  { %561 = vsyncpa [#allocation3 + $0x1], 1 }
 0x217   :  { %562 = vsyncpa [#allocation4], 1 }
 0x218   :  { %564 = vsyncpa [#allocation4 + $0x1], 1 }

</bundles_post_ra>
